<compile_context>
chip_gen: v5e
topology: v5e:2x2
jax: 0.10.0
libtpu: 0.0.40
codegen_flags: <defaults>
</compile_context>

<pallas_src>
import jax
import jax.numpy as jnp
from jax.experimental import pallas as pl
from jax.experimental.pallas import tpu as pltpu

_LANE = 128     # vreg lane width  (last dim)
_SUBLANE = 8    # vreg sublane width (second-to-last dim)


def _round_up(n, m):
    return ((n + m - 1) // m) * m


def _sigmoid_eup(z):
    # exp issues on the EUP, approximate reciprocal on the EUP/vrcp slot:
    # the nonlinearity is effectively free next to the MXU work.
    return pl.reciprocal(1.0 + jnp.exp(-z), approx=True)


def _mlp_forward_kernel(x_ref, wih_ref, who_ref, o_ref):
    # Layer 1: [TB, in_p] @ [in_p, hid_p] on the MXU, f32 accumulation.
    z1 = jnp.dot(x_ref[...], wih_ref[...], preferred_element_type=jnp.float32)
    h1 = _sigmoid_eup(z1)
    # Layer 2: cast the activation back to the compute dtype so the MXU stays in bf16 mode.
    z2 = jnp.dot(h1.astype(who_ref.dtype), who_ref[...],
                 preferred_element_type=jnp.float32)
    o_ref[...] = _sigmoid_eup(z2).astype(o_ref.dtype)


def neural_network_forward(x, weight_ih, weight_ho, *,
                           compute_dtype=jnp.bfloat16, batch_tile=256):
    """Forward pass of NeuralNetwork: sigmoid(sigmoid(x @ W_ih) @ W_ho)."""
    B, in_dim = x.shape
    in_dim2, hid = weight_ih.shape
    hid2, out_dim = weight_ho.shape
    assert in_dim == in_dim2 and hid == hid2

    out_dtype = x.dtype
    cdt = jnp.dtype(compute_dtype)

    # ---- pad feature dims to full lane tiles, batch to sublane multiples --------------
    in_p = _round_up(in_dim, _LANE)
    hid_p = _round_up(hid, _LANE)
    out_p = _round_up(out_dim, _LANE)
    b_p = _round_up(B, _SUBLANE)

    tb = min(_round_up(batch_tile, _SUBLANE), b_p)   # batch tile (rows per grid step)
    b_p = _round_up(b_p, tb)                         # grid covers the batch exactly
    grid = (b_p // tb,)

    # Zero padding is numerically exact for the forward pass:
    #  - padded input columns of X / rows of W_ih contribute 0 to z1;
    #  - padded hidden columns give sigmoid(0)=0.5 but multiply zero rows of W_ho;
    #  - padded output columns (sigmoid(0)=0.5) are sliced off before returning.
    x_p = jnp.zeros((b_p, in_p), cdt).at[:B, :in_dim].set(x.astype(cdt))
    wih_p = jnp.zeros((in_p, hid_p), cdt).at[:in_dim, :hid].set(weight_ih.astype(cdt))
    who_p = jnp.zeros((hid_p, out_p), cdt).at[:hid, :out_dim].set(weight_ho.astype(cdt))

    # ---- VMEM budget: double-buffered activation tiles + resident weights -------------
    cb = cdt.itemsize
    ob = jnp.dtype(out_dtype).itemsize
    tile_bytes = (2 * tb * in_p * cb                       # X tile (double buffered)
                  + 2 * tb * out_p * ob                    # output tile (double buffered)
                  + 2 * (in_p * hid_p + hid_p * out_p) * cb  # weights
                  + tb * hid_p * (4 + cb)                  # z1 (f32) + h1 (compute dtype)
                  + tb * out_p * 4)                        # z2 (f32)
    vmem_limit = int(min(max(2 * tile_bytes, 16 * 1024 * 1024), 64 * 1024 * 1024))

    cost = pl.CostEstimate(
        flops=2 * b_p * in_p * hid_p + 2 * b_p * hid_p * out_p,
        transcendentals=b_p * (hid_p + out_p),
        bytes_accessed=(b_p * in_p + in_p * hid_p + hid_p * out_p) * cb + b_p * out_p * ob,
    )

    out_padded = pl.pallas_call(
        _mlp_forward_kernel,
        out_shape=jax.ShapeDtypeStruct((b_p, out_p), out_dtype),
        grid_spec=pltpu.PrefetchScalarGridSpec(
            num_scalar_prefetch=0,
            grid=grid,
            in_specs=[
                pl.BlockSpec((tb, in_p), lambda i: (i, 0)),      # batch-tiled X
                pl.BlockSpec((in_p, hid_p), lambda i: (0, 0)),   # W_ih resident in VMEM
                pl.BlockSpec((hid_p, out_p), lambda i: (0, 0)),  # W_ho resident in VMEM
            ],
            out_specs=pl.BlockSpec((tb, out_p), lambda i: (i, 0)),
        ),
        compiler_params=pltpu.CompilerParams(
            dimension_semantics=("parallel",),   # shard batch tiles across TensorCores
            vmem_limit_bytes=vmem_limit,
        ),
        cost_estimate=cost,
    )(x_p, wih_p, who_p)

    # Drop batch/feature padding (padded output columns are sigmoid(0)=0.5, not zero).
    return out_padded[:B, :out_dim]


def reference_forward(x, weight_ih, weight_ho, compute_dtype=None):
    """Pure-JAX reference; optionally mirrors the kernel's operand cast."""
    if compute_dtype is not None:
        x = x.astype(compute_dtype)
        weight_ih = weight_ih.astype(compute_dtype)
        weight_ho = weight_ho.astype(compute_dtype)
    z1 = jnp.dot(x, weight_ih, preferred_element_type=jnp.float32)
    h1 = jax.nn.sigmoid(z1)
    z2 = jnp.dot(h1.astype(weight_ho.dtype), weight_ho,
                 preferred_element_type=jnp.float32)
    return jax.nn.sigmoid(z2)


if __name__ == "__main__":
    # layer_structure = [input_size, hidden_size, output_size]
    input_size, hidden_size, output_size = 16, 32, 8
    batch = 4

    key = jax.random.PRNGKey(0)
    k_x, k_wih, k_who = jax.random.split(key, 3)

    x = jax.random.normal(k_x, (batch, input_size), dtype=jnp.float32)
    weight_ih = jax.random.normal(k_wih, (input_size, hidden_size), dtype=jnp.float32)
    weight_ho = jax.random.normal(k_who, (hidden_size, output_size), dtype=jnp.float32)

    out = neural_network_forward(x, weight_ih, weight_ho)
    out = jax.block_until_ready(out)
    assert out.shape == (batch, output_size)
    assert bool(jnp.all(jnp.isfinite(out)))

    # Tight check against a reference that uses the same bf16 operand cast
    # (differences: approx reciprocal + accumulation order only).
    ref_bf16 = reference_forward(x, weight_ih, weight_ho, compute_dtype=jnp.bfloat16)
    assert jnp.allclose(out, ref_bf16, atol=2e-2, rtol=2e-2), "mismatch vs bf16 reference"

    # Looser sanity check against the full-fp32 forward (bf16 operands => ~1e-2 abs error).
    ref_f32 = reference_forward(x, weight_ih, weight_ho)
    assert jnp.allclose(out, ref_f32, atol=1e-1, rtol=1e-1), "mismatch vs fp32 reference"

    print("KERNEL_OK")
</pallas_src>

<mosaic_0001>
module attributes {stable_mosaic.version = 11 : i64} {
  func.func @_mlp_forward_kernel(%arg0: i32, %arg1: memref<8x128xbf16, #tpu.memory_space<vmem>>, %arg2: memref<128x128xbf16, #tpu.memory_space<vmem>>, %arg3: memref<128x128xbf16, #tpu.memory_space<vmem>>, %arg4: memref<8x128xf32, #tpu.memory_space<vmem>>) attributes {dimension_semantics = [#tpu.dimension_semantics<parallel>], iteration_bounds = array<i64: 1>, scalar_prefetch = 0 : i64, scratch_operands = 0 : i64, tpu.core_type = #tpu.core_type<tc>, window_params = [{transform_indices = @transform_0, window_bounds = array<i64: 8, 128>}, {pipeline_mode = #tpu.pipeline_mode<synchronous>, transform_indices = @transform_1, window_bounds = array<i64: 128, 128>}, {pipeline_mode = #tpu.pipeline_mode<synchronous>, transform_indices = @transform_2, window_bounds = array<i64: 128, 128>}, {transform_indices = @transform_3, window_bounds = array<i64: 8, 128>}]} {
    %c0 = arith.constant 0 : index
    %c0_0 = arith.constant 0 : index
    %0 = vector.load %arg1[%c0, %c0_0] : memref<8x128xbf16, #tpu.memory_space<vmem>>, vector<8x128xbf16>
    %c0_1 = arith.constant 0 : index
    %c0_2 = arith.constant 0 : index
    %1 = vector.load %arg2[%c0_1, %c0_2] : memref<128x128xbf16, #tpu.memory_space<vmem>>, vector<128x128xbf16>
    %cst = arith.constant dense<0.000000e+00> : vector<8x128xf32>
    %2 = tpu.matmul %0, %1, %cst {dimension_numbers = #tpu.dot_dimension_numbers<[1], [0], [0], [1], [0, 0, 1, 1], [], []>} : vector<8x128xbf16>, vector<128x128xbf16>, vector<8x128xf32> -> vector<8x128xf32>
    %cst_3 = arith.constant 0.000000e+00 : f32
    %3 = vector.broadcast %cst_3 : f32 to vector<8x128xf32>
    %4 = arith.subf %3, %2 : vector<8x128xf32>
    %5 = math.exp %4 : vector<8x128xf32>
    %cst_4 = arith.constant 1.000000e+00 : f32
    %6 = vector.broadcast %cst_4 : f32 to vector<8x128xf32>
    %7 = arith.addf %6, %5 : vector<8x128xf32>
    %8 = tpu.reciprocal %7 {approx = true} : vector<8x128xf32> -> vector<8x128xf32>
    %9 = arith.truncf %8 : vector<8x128xf32> to vector<8x128xbf16>
    %c0_5 = arith.constant 0 : index
    %c0_6 = arith.constant 0 : index
    %10 = vector.load %arg3[%c0_5, %c0_6] : memref<128x128xbf16, #tpu.memory_space<vmem>>, vector<128x128xbf16>
    %cst_7 = arith.constant dense<0.000000e+00> : vector<8x128xf32>
    %11 = tpu.matmul %9, %10, %cst_7 {dimension_numbers = #tpu.dot_dimension_numbers<[1], [0], [0], [1], [0, 0, 1, 1], [], []>} : vector<8x128xbf16>, vector<128x128xbf16>, vector<8x128xf32> -> vector<8x128xf32>
    %cst_8 = arith.constant 0.000000e+00 : f32
    %12 = vector.broadcast %cst_8 : f32 to vector<8x128xf32>
    %13 = arith.subf %12, %11 : vector<8x128xf32>
    %14 = math.exp %13 : vector<8x128xf32>
    %cst_9 = arith.constant 1.000000e+00 : f32
    %15 = vector.broadcast %cst_9 : f32 to vector<8x128xf32>
    %16 = arith.addf %15, %14 : vector<8x128xf32>
    %17 = tpu.reciprocal %16 {approx = true} : vector<8x128xf32> -> vector<8x128xf32>
    %c0_10 = arith.constant 0 : index
    %c0_11 = arith.constant 0 : index
    %18 = vector.load %arg4[%c0_10, %c0_11] : memref<8x128xf32, #tpu.memory_space<vmem>>, vector<8x128xf32>
    tpu.vector_store %arg4[%c0_10, %c0_11], %17 {strides = array<i32>} : memref<8x128xf32, #tpu.memory_space<vmem>>, vector<8x128xf32>,
    return
  }
  func.func @transform_0(%arg0: i32) -> (i32, i32) {
    %c0_i32 = arith.constant 0 : i32
    %c0_i32_0 = arith.constant 0 : i32
    return %arg0, %c0_i32 : i32, i32
  }
  func.func @transform_1(%arg0: i32) -> (i32, i32) {
    %c0_i32 = arith.constant 0 : i32
    %c0_i32_0 = arith.constant 0 : i32
    %c0_i32_1 = arith.constant 0 : i32
    return %c0_i32, %c0_i32_0 : i32, i32
  }
  func.func @transform_2(%arg0: i32) -> (i32, i32) {
    %c0_i32 = arith.constant 0 : i32
    %c0_i32_0 = arith.constant 0 : i32
    %c0_i32_1 = arith.constant 0 : i32
    return %c0_i32, %c0_i32_0 : i32, i32
  }
  func.func @transform_3(%arg0: i32) -> (i32, i32) {
    %c0_i32 = arith.constant 0 : i32
    %c0_i32_0 = arith.constant 0 : i32
    return %arg0, %c0_i32 : i32, i32
  }
}

</mosaic_0001>

<bundles_post_ra>
// kernel: tpu_custom_call.1
= control target key start
LH: loop header
LB: loop body
LE: loop exit
PB: predicated region body
PF: predicated region fallthrough
CT: control target
= control target key end

     0   :  { %8 = vsyncpa [#allocation3], 0  ;;  %s479_s0 = inlined_call_operand.hbm [shape: bf16[8,128], index: 0, kind: input, shape index: {}]   ;;  %s480_s1 = inlined_call_operand.hbm [shape: bf16[128,128], index: 1, kind: input, shape index: {}]   ;;  %s481_s2 = inlined_call_operand.hbm [shape: bf16[128,128], index: 2, kind: input, shape index: {}]   ;;  %s482_s3 = inlined_call_operand.hbm [shape: f32[8,128], index: 3, kind: output, shape index: {}]  }
   0x1   :  { %9 = vsyncpa [#allocation6], 0  ;;  %s26_s14 = sshll.u32 %s480_s1, 4  ;;  %s27_s14 = int_to_ptr.hbm [resolvable:$true] %s26_s14 }
   0x2   :  { %10 = vsyncpa [#allocation4], 0  ;;  %s441_s15 = smov [#allocation5]   ;;  %s16_s19 = sshll.u32 %s479_s0, 4  ;;  %s17_s19 = int_to_ptr.hbm [resolvable:$true] %s16_s19 }
   0x3   :  { %s28_s16 = sshll.u32 %s441_s15, 4  ;;  %s442_s20 = smov 64   ;;  %s29_s16 = int_to_ptr.vmem [resolvable:$true] %s28_s16 }
   0x4   :  { %s443_s21 = smov 4   ;;  %s444_s22 = smov [#allocation2]  }
   0x5   :  { %34 = dma.hbm_to_vmem [thread:$0]  %s27_s14, 1024, %s29_s16, [#allocation6], %s442_s20, %s442_s20, %s443_s21  }
   0x6   :  { %s18_s23 = sshll.u32 %s444_s22, 4  ;;  %s39_s26 = sshll.u32 %s481_s2, 4  ;;  %s19_s23 = int_to_ptr.vmem [resolvable:$true] %s18_s23  ;;  %s40_s26 = int_to_ptr.hbm [resolvable:$true] %s39_s26 }
   0x7   :  { %21 = dma.hbm_to_vmem [thread:$0]  %s17_s19, 64, %s19_s23, [#allocation3]  }
   0x8   :  { %s445_s1 = smov [#allocation7]  }
   0x9   :  { %s41_s27 = sshll.u32 %s445_s1, 4  ;;  %s42_s27 = int_to_ptr.vmem [resolvable:$true] %s41_s27 }
   0xa   :  { %47 = dma.hbm_to_vmem [thread:$0]  %s40_s26, 1024, %s42_s27, [#allocation6], %s442_s20, %s442_s20, %s443_s21  }
   0xb   :  { %435 = dma.done.wait [#allocation3], 64  }
   0xc   :  { %436 = vsyncadd [#allocation3], 4294967232 }
   0xd   :  { %437 = dma.done.wait [#allocation6], 2048  }
   0xe   :  { %438 = vsyncadd [#allocation6], 4294965248  ;;  %v316_v0 = vld [vmem:[#allocation5 + $0x38] sm:$0xff]  ;;  %v315_v1 = vld [vmem:[#allocation5 + $0x30] sm:$0xff]  ;;  %s446_s0 = smov [#allocation8]   ;;  %s234_s30 = sshll.u32 %s482_s3, 4  ;;  %s235_s30 = int_to_ptr.hbm [resolvable:$true] %s234_s30 }
   0xf   :  { %125 = vmatpush.bf16.msra.mxu0 %v316_v0  ;;  %v324_v2 = vld [vmem:[#allocation7 + $0x38] sm:$0xff]  ;;  %v323_v3 = vld [vmem:[#allocation7 + $0x30] sm:$0xff]  ;;  %v314_v4 = vld [vmem:[#allocation5 + $0x28] sm:$0xff]  ;;  %s232_s2 = sshll.u32 %s446_s0, 4  ;;  %s233_s2 = int_to_ptr.vmem [resolvable:$true] %s232_s2 }
  0x10   :  { %208 = vmatpush.bf16.msra.mxu1 %v324_v2  ;;  %v313_v5 = vld [vmem:[#allocation5 + $0x20] sm:$0xff]  ;;  %v312_v6 = vld [vmem:[#allocation5 + $0x18] sm:$0xff]  ;;  %v311_v7 = vld [vmem:[#allocation5 + $0x10] sm:$0xff] }
  0x11   :  { %v310_v8 = vld [vmem:[#allocation5 + $0x8] sm:$0xff]  ;;  %v309_v9 = vld [vmem:[#allocation5] sm:$0xff]  ;;  %v60_v10 = vld [vmem:[#allocation2] sm:$0xf] }
  0x12   :  { %v322_v11 = vld [vmem:[#allocation7 + $0x28] sm:$0xff]  ;;  %v321_v12 = vld [vmem:[#allocation7 + $0x20] sm:$0xff]  ;;  %v320_v13 = vld [vmem:[#allocation7 + $0x18] sm:$0xff] }
  0x13   :  { %126 = vmatpush.bf16.msra.mxu0 %v315_v1  ;;  %v319_v14 = vld [vmem:[#allocation7 + $0x10] sm:$0xff]  ;;  %v318_v15 = vld [vmem:[#allocation7 + $0x8] sm:$0xff]  ;;  %v317_v16 = vld [vmem:[#allocation7] sm:$0xff] }
  0x14   :  { %209 = vmatpush.bf16.msra.mxu1 %v323_v3 }
  0x17   :  { %127 = vmatpush.bf16.msra.mxu0 %v314_v4 }
  0x18   :  { %210 = vmatpush.bf16.msra.mxu1 %v322_v11 }
  0x1b   :  { %128 = vmatpush.bf16.msra.mxu0 %v313_v5 }
  0x1c   :  { %211 = vmatpush.bf16.msra.mxu1 %v321_v12 }
  0x1f   :  { %129 = vmatpush.bf16.msra.mxu0 %v312_v6 }
  0x20   :  { %212 = vmatpush.bf16.msra.mxu1 %v320_v13 }
  0x23   :  { %130 = vmatpush.bf16.msra.mxu0 %v311_v7 }
  0x24   :  { %213 = vmatpush.bf16.msra.mxu1 %v319_v14 }
  0x27   :  { %131 = vmatpush.bf16.msra.mxu0 %v310_v8 }
  0x28   :  { %214 = vmatpush.bf16.msra.mxu1 %v318_v15 }
  0x2b   :  { %132 = vmatpush.bf16.msra.mxu0 %v309_v9 }
  0x2c   :  { %215 = vmatpush.bf16.msra.mxu1 %v317_v16 }
  0x2e   :  { %133 = vmatmul.bf16.vlgmr.msra.gmra.mxu0 %v60_v10 }
  0xab   :  { %v134_v17 = vpop.f32.mrf.mxu0 }
  0xac   :  { %v138_v18 = vsub.f32 0.0, %v134_v17 }
  0xae   :  { %v139_v19 = vmul.f32 1.442695, %v138_v18 }
  0xb0   :  { %331 = vpow2.f32 %v139_v19 }
  0xb3   :  { %v136_v20 = vpop.f32.mrf.mxu0 }
  0xb6   :  { %v332_v21 = vpop.eup %331 }
  0xb7   :  { %v141_v22 = vadd.f32 1.0, %v332_v21 }
  0xb9   :  { %333 = vrcp.f32 %v141_v22 }
  0xbf   :  { %v334_v23 = vpop.eup %333 }
  0xc0   :  { %v143_v24 = vpack.c.bf16 %v334_v23, %v334_v23 }
  0xc2   :  { %216 = vmatmul.bf16.vlgmr.msra.gmra.mxu1 %v143_v24 }
 0x13f   :  { %v217_v25 = vpop.f32.mrf.mxu1 }
 0x140   :  { %v221_v26 = vsub.f32 0.0, %v217_v25 }
 0x142   :  { %v222_v27 = vmul.f32 1.442695, %v221_v26 }
 0x144   :  { %335 = vpow2.f32 %v222_v27 }
 0x147   :  { %v219_v28 = vpop.f32.mrf.mxu1 }
 0x14a   :  { %v336_v29 = vpop.eup %335 }
 0x14b   :  { %v224_v30 = vadd.f32 1.0, %v336_v29 }
 0x14d   :  { %337 = vrcp.f32 %v224_v30 }
 0x153   :  { %v338_v31 = vpop.eup %337 }
 0x154   :  { %226 = vst [vmem:[#allocation8] sm:$0xff] %v338_v31 }
 0x155   :  { %237 = dma.vmem_to_hbm [thread:$0]  %s233_s2, 128, %s235_s30, [#allocation4]  }
 0x156   :  { %439 = dma.done.wait [#allocation4], 128  }
 0x157   :  { %440 = vsyncadd [#allocation4], 4294967168 }
 0x158   :  { %242 = vsyncpa [#allocation3], 1 }
 0x159   :  { %243 = vsyncpa [#allocation6], 1 }
 0x15a   :  { %244 = vsyncpa [#allocation4], 1 }

</bundles_post_ra>
